<compile_context>
chip_gen: v5e
topology: v5e:2x2
jax: 0.10.0
libtpu: 0.0.40
codegen_flags: <defaults>
</compile_context>

<pallas_src>
import jax
import jax.numpy as jnp
import numpy as np
from jax import lax
from jax.experimental import pallas as pl
from jax.experimental.pallas import tpu as pltpu


def _round_up(x, m):
    return (x + m - 1) // m * m


# --------------------------------------------------------------------------- #
# Per-layer fused Conv1d (+ bias + optional leaky_relu) kernel
# --------------------------------------------------------------------------- #
def _build_conv_kernel(*, K, Cin, Cout, groups, fold, tap_phase, tap_off,
                       halo, TILE_T, activate):
    """One grid step == one (batch, time-tile).  Layout: (channels, time)."""
    Cin_g = Cin // groups
    Cout_g = Cout // groups

    def kernel(xm_ref, xh_ref, w_ref, b_ref, o_ref):
        xm = xm_ref[0]                                        # (P*Cin, TILE_T)
        if halo:
            # One lane-aligned concat per tile (both widths are 128-multiples).
            xw = jnp.concatenate([xm, xh_ref[0]], axis=-1)    # (P*Cin, TILE_T+HB)
        else:
            xw = xm
        bias = b_ref[...]                                     # (Cout, 1) f32

        def tap_dot(wj, c0, cn, j):
            xt = xw[c0:c0 + cn, tap_off[j]:tap_off[j] + TILE_T]
            return jnp.dot(wj, xt, preferred_element_type=jnp.float32)

        if fold:
            # Block-diagonal folded weights: one dot per tap over all channels.
            acc = None
            for j in range(K):
                c0 = tap_phase[j] * Cin
                d = tap_dot(w_ref[j], c0, Cin, j)
                acc = d if acc is None else acc + d
            y = acc + bias
            if activate:
                y = jnp.where(y >= 0, y, 0.2 * y)             # leaky_relu(0.2)
            o_ref[0] = y.astype(o_ref.dtype)
        else:
            # Wide grouped layers: per-group tap dots, write straight into the
            # output channel slice (no concatenate of group outputs).
            for g in range(groups):
                acc = None
                for j in range(K):
                    c0 = tap_phase[j] * Cin + g * Cin_g
                    d = tap_dot(w_ref[g, j], c0, Cin_g, j)
                    acc = d if acc is None else acc + d
                y = acc + bias[g * Cout_g:(g + 1) * Cout_g]
                if activate:
                    y = jnp.where(y >= 0, y, 0.2 * y)
                o_ref[0, g * Cout_g:(g + 1) * Cout_g, :] = y.astype(o_ref.dtype)

    return kernel


def _conv_pallas_call(kernel, xph, wk, bias, *, B, Cp, Cout, TILE_T, HB, TPH,
                      nT, T_out_pad, out_dtype, vmem_limit,
                      single_buffer_consts):
    const_kw = (dict(pipeline_mode=pl.Buffered(1))
                if single_buffer_consts else {})
    in_specs = [
        # main time tile
        pl.BlockSpec((1, Cp, TILE_T), lambda b, t: (b, 0, t)),
        # halo: a small 128-aligned block taken from the *next* tile position
        pl.BlockSpec((1, Cp, HB), lambda b, t: (b, 0, (t + 1) * TPH)),
        # grid-invariant weights / bias (single-buffered when supported)
        pl.BlockSpec(wk.shape, lambda b, t: (0,) * wk.ndim, **const_kw),
        pl.BlockSpec(bias.shape, lambda b, t: (0, 0), **const_kw),
    ]
    return pl.pallas_call(
        kernel,
        out_shape=jax.ShapeDtypeStruct((B, Cout, T_out_pad), out_dtype),
        grid=(B, nT),
        in_specs=in_specs,
        out_specs=pl.BlockSpec((1, Cout, TILE_T), lambda b, t: (b, 0, t)),
        compiler_params=pltpu.CompilerParams(
            dimension_semantics=("parallel", "parallel"),
            vmem_limit_bytes=vmem_limit),
    )(xph, xph, wk, bias)


def conv1d_pallas(x, w, b, *, stride, dilation, groups, padding, activate,
                  tile_t=2048, use_bf16=True):
    """x: (B, Cin, T); w: (Cout, Cin/groups, K) (PyTorch layout); b: (Cout,)."""
    B, Cin, T = x.shape
    Cout, Cin_g, K = w.shape
    assert Cin_g * groups == Cin and Cout % groups == 0
    Cout_g = Cout // groups
    cdtype = jnp.bfloat16 if use_bf16 else jnp.float32

    Tp = T + 2 * padding
    span = dilation * (K - 1)
    T_out = (Tp - span - 1) // stride + 1

    # ---- pad once + polyphase decomposition (wrapper / HBM, no in-kernel pad) ----
    x_pad = jnp.pad(x.astype(cdtype), ((0, 0), (0, 0), (padding, padding)))
    taps = [j * dilation for j in range(K)]
    if stride == 1:
        tap_phase = [0] * K
        tap_off = list(taps)
        xph = x_pad
        P = 1
    else:
        phase_r = [t % stride for t in taps]
        phases = sorted(set(phase_r))          # only phases actually referenced
        tap_phase = [phases.index(r) for r in phase_r]
        tap_off = [t // stride for t in taps]
        planes = [x_pad[:, :, r::stride] for r in phases]
        lmax = max(p.shape[-1] for p in planes)
        planes = [jnp.pad(p, ((0, 0), (0, 0), (0, lmax - p.shape[-1])))
                  for p in planes]
        xph = planes[0] if len(planes) == 1 else jnp.concatenate(planes, axis=1)
        P = len(phases)
    Cp = P * Cin
    A = max(tap_off)                            # halo width in phase space

    # ---- 128-aligned time tiles + halo block ----
    HB = _round_up(max(A, 1), 128)
    TILE_T = min(_round_up(max(tile_t, 128), 128), _round_up(T_out, 128))
    TILE_T = _round_up(TILE_T, HB)              # halo block must divide the tile
    TPH = TILE_T // HB
    nT = pl.cdiv(T_out, TILE_T)
    T_out_pad = nT * TILE_T
    L_need = T_out_pad + HB
    if xph.shape[-1] < L_need:
        xph = jnp.pad(xph, ((0, 0), (0, 0), (0, L_need - xph.shape[-1])))

    # ---- weight packing ----
    # Fold small grouped layers into one block-diagonal weight (one dot per tap);
    # keep a per-group loop for very wide grouped layers.
    fold = (groups == 1) or (Cin <= 256 and Cout <= 256)
    wt = jnp.transpose(w, (2, 0, 1)).astype(cdtype)            # (K, Cout, Cin_g)
    if fold:
        if groups == 1:
            wk = wt                                            # (K, Cout, Cin)
        else:
            wk = jnp.zeros((K, Cout, Cin), cdtype)
            for g in range(groups):
                wk = wk.at[:, g * Cout_g:(g + 1) * Cout_g,
                           g * Cin_g:(g + 1) * Cin_g].set(
                    wt[:, g * Cout_g:(g + 1) * Cout_g, :])
    else:
        wk = jnp.transpose(w.reshape(groups, Cout_g, Cin_g, K),
                           (0, 3, 1, 2)).astype(cdtype)        # (G, K, Cout_g, Cin_g)
    bias = b.reshape(Cout, 1).astype(jnp.float32)

    kernel = _build_conv_kernel(K=K, Cin=Cin, Cout=Cout, groups=groups,
                                fold=fold, tap_phase=tap_phase, tap_off=tap_off,
                                halo=A > 0, TILE_T=TILE_T, activate=activate)

    # ---- VMEM budget -> vmem_limit_bytes (never below the 32 MiB default,
    #      capped at v7x's 64 MiB physical VMEM) ----
    isz = jnp.dtype(cdtype).itemsize
    cp8, co8 = _round_up(Cp, 8), _round_up(Cout, 8)
    est = (2 * cp8 * (TILE_T + HB) * isz * 2      # main + halo inputs, double-buffered
           + 2 * co8 * TILE_T * isz               # output tile, double-buffered
           + 2 * co8 * TILE_T * 4                 # f32 accumulator + temps
           + cp8 * (TILE_T + HB) * isz            # in-kernel halo concat
           + int(wk.size) * isz + Cout * 4)
    vmem_limit = int(min(64 * 2 ** 20, max(32 * 2 ** 20, 4 * est)))

    def _call(single_buffer_consts):
        return _conv_pallas_call(
            kernel, xph, wk, bias, B=B, Cp=Cp, Cout=Cout, TILE_T=TILE_T, HB=HB,
            TPH=TPH, nT=nT, T_out_pad=T_out_pad, out_dtype=cdtype,
            vmem_limit=vmem_limit, single_buffer_consts=single_buffer_consts)

    try:
        out = _call(True)
    except Exception:        # pragma: no cover -- jax build without pl.Buffered(1)
        out = _call(False)
    return out[:, :, :T_out]


# --------------------------------------------------------------------------- #
# CoMBDBlock.forward (Pallas kernels + JAX glue for batch split / tile)
# --------------------------------------------------------------------------- #
def combd_block_forward(x, params, b_y, b_y_hat, cfg, *, use_bf16=True,
                        tile_t=2048):
    fmap_r, fmap_g = [], []
    h = x
    for (w, b), s, d, g, p in zip(params["convs"], cfg["d_s"], cfg["d_d"],
                                  cfg["d_g"], cfg["d_p"]):
        h = conv1d_pallas(h, w, b, stride=s, dilation=d, groups=g, padding=p,
                          activate=True, tile_t=tile_t, use_bf16=use_bf16)
        f_r, f_g = h[:b_y], h[b_y:]
        fmap_r.append(jnp.tile(f_r, (2, 1, 1)) if b_y < b_y_hat else f_r)
        fmap_g.append(f_g)

    pw, pb = params["proj"]
    h = conv1d_pallas(h, pw, pb, stride=1, dilation=1, groups=cfg["op_g"],
                      padding=0, activate=False, tile_t=tile_t,
                      use_bf16=use_bf16)
    x_r, x_g = h[:b_y], h[b_y:]
    x_r = jnp.tile(x_r, (2, 1, 1)) if b_y < b_y_hat else x_r
    return x_r, x_g, fmap_r, fmap_g


# --------------------------------------------------------------------------- #
# Pure-JAX reference (for verification, always f32)
# --------------------------------------------------------------------------- #
def _conv1d_ref(x, w, b, *, stride, dilation, groups, padding):
    y = lax.conv_general_dilated(
        x, w, window_strides=(stride,), padding=[(padding, padding)],
        rhs_dilation=(dilation,), dimension_numbers=("NCH", "OIH", "NCH"),
        feature_group_count=groups)
    return y + b[None, :, None]


def combd_block_ref(x, params, b_y, b_y_hat, cfg):
    fmap_r, fmap_g = [], []
    h = x
    for (w, b), s, d, g, p in zip(params["convs"], cfg["d_s"], cfg["d_d"],
                                  cfg["d_g"], cfg["d_p"]):
        h = _conv1d_ref(h, w, b, stride=s, dilation=d, groups=g, padding=p)
        h = jnp.where(h >= 0, h, 0.2 * h)
        f_r, f_g = h[:b_y], h[b_y:]
        fmap_r.append(jnp.tile(f_r, (2, 1, 1)) if b_y < b_y_hat else f_r)
        fmap_g.append(f_g)
    pw, pb = params["proj"]
    h = _conv1d_ref(h, pw, pb, stride=1, dilation=1, groups=cfg["op_g"],
                    padding=0)
    x_r, x_g = h[:b_y], h[b_y:]
    x_r = jnp.tile(x_r, (2, 1, 1)) if b_y < b_y_hat else x_r
    return x_r, x_g, fmap_r, fmap_g


def _to_np32(a):
    return np.asarray(a.astype(jnp.float32))


# --------------------------------------------------------------------------- #
if __name__ == "__main__":
    # Small CoMBDBlock configuration.
    h_u = [4, 8, 16]
    cfg = dict(
        d_k=(7, 5, 3),
        d_s=(1, 2, 1),
        d_d=(1, 2, 1),
        d_g=(1, 2, 1),
        d_p=(3, 4, 1),
        op_f=1, op_k=3, op_g=1,
    )
    filters = [[1, h_u[0]]] + [[h_u[i], h_u[i + 1]] for i in range(len(h_u) - 1)]

    b_y, b_y_hat = 1, 2            # exercises the b_y < b_y_hat tile branch
    B = b_y + b_y_hat
    T = 400                        # > 128 so the multi-tile + halo path runs

    key = jax.random.PRNGKey(0)
    keys = jax.random.split(key, 2 * len(filters) + 3)

    convs = []
    for i, ((cin, cout), k, g) in enumerate(zip(filters, cfg["d_k"], cfg["d_g"])):
        w = 0.2 * jax.random.normal(keys[2 * i], (cout, cin // g, k), jnp.float32)
        bia = 0.1 * jax.random.normal(keys[2 * i + 1], (cout,), jnp.float32)
        convs.append((w, bia))
    pw = 0.2 * jax.random.normal(
        keys[-3], (cfg["op_f"], filters[-1][1] // cfg["op_g"], cfg["op_k"]),
        jnp.float32)
    pb = 0.1 * jax.random.normal(keys[-2], (cfg["op_f"],), jnp.float32)
    params = dict(convs=convs, proj=(pw, pb))

    x = jax.random.normal(keys[-1], (B, 1, T), jnp.float32)

    # Production-style bf16 path (HBM-resident bf16 operands, f32 accumulation).
    # tile_t=128 forces several time tiles at this toy length (default 2048).
    xr16, xg16, _, _ = combd_block_forward(x, params, b_y, b_y_hat, cfg,
                                           use_bf16=True, tile_t=128)
    xr16 = jax.block_until_ready(xr16)

    # Exact f32 path for the tight reference check.
    xr32, xg32, fr32, fg32 = combd_block_forward(x, params, b_y, b_y_hat, cfg,
                                                 use_bf16=False, tile_t=128)
    xr32 = jax.block_until_ready(xr32)

    # Reference.
    xr_ref, xg_ref, fr_ref, fg_ref = combd_block_ref(x, params, b_y, b_y_hat, cfg)

    # f32 path: exact (same arithmetic, f32 accumulation).
    np.testing.assert_allclose(_to_np32(xr32), _to_np32(xr_ref),
                               rtol=1e-4, atol=1e-4)
    np.testing.assert_allclose(_to_np32(xg32), _to_np32(xg_ref),
                               rtol=1e-4, atol=1e-4)
    for a, r in zip(fr32, fr_ref):
        np.testing.assert_allclose(_to_np32(a), _to_np32(r), rtol=1e-4, atol=1e-4)
    for a, r in zip(fg32, fg_ref):
        np.testing.assert_allclose(_to_np32(a), _to_np32(r), rtol=1e-4, atol=1e-4)

    # bf16 path: loose sanity check (bf16 operands, documented tolerance).
    assert xr16.shape == xr_ref.shape and xg16.shape == xg_ref.shape
    assert bool(jnp.all(jnp.isfinite(xr16))) and bool(jnp.all(jnp.isfinite(xg16)))
    np.testing.assert_allclose(_to_np32(xr16), _to_np32(xr_ref),
                               rtol=1e-1, atol=1e-1)
    np.testing.assert_allclose(_to_np32(xg16), _to_np32(xg_ref),
                               rtol=1e-1, atol=1e-1)

    print("KERNEL_OK")
</pallas_src>

<mosaic_0001>
module attributes {stable_mosaic.version = 11 : i64} {
  func.func @kernel(%arg0: i32, %arg1: i32, %arg2: memref<1x1x128xbf16, #tpu.memory_space<vmem>>, %arg3: memref<1x1x128xbf16, #tpu.memory_space<vmem>>, %arg4: memref<7x4x1xbf16, #tpu.memory_space<vmem>>, %arg5: memref<4x1xf32, #tpu.memory_space<vmem>>, %arg6: memref<1x4x128xbf16, #tpu.memory_space<vmem>>) attributes {dimension_semantics = [#tpu.dimension_semantics<parallel>, #tpu.dimension_semantics<parallel>], iteration_bounds = array<i64: 3, 4>, scalar_prefetch = 0 : i64, scratch_operands = 0 : i64, tpu.core_type = #tpu.core_type<tc>, window_params = [{transform_indices = @transform_0, window_bounds = array<i64: 1, 1, 128>}, {transform_indices = @transform_1, window_bounds = array<i64: 1, 1, 128>}, {pipeline_mode = #tpu.pipeline_mode<synchronous>, transform_indices = @transform_2, window_bounds = array<i64: 7, 4, 1>}, {pipeline_mode = #tpu.pipeline_mode<synchronous>, transform_indices = @transform_3, window_bounds = array<i64: 4, 1>}, {transform_indices = @transform_4, window_bounds = array<i64: 1, 4, 128>}]} {
    %c0 = arith.constant 0 : index
    %c0_0 = arith.constant 0 : index
    %c0_1 = arith.constant 0 : index
    %0 = vector.load %arg2[%c0, %c0_0, %c0_1] : memref<1x1x128xbf16, #tpu.memory_space<vmem>>, vector<1x1x128xbf16>
    %1 = vector.shape_cast %0 : vector<1x1x128xbf16> to vector<1x128xbf16>
    %c0_2 = arith.constant 0 : index
    %c0_3 = arith.constant 0 : index
    %c0_4 = arith.constant 0 : index
    %2 = vector.load %arg3[%c0_2, %c0_3, %c0_4] : memref<1x1x128xbf16, #tpu.memory_space<vmem>>, vector<1x1x128xbf16>
    %3 = vector.shape_cast %2 : vector<1x1x128xbf16> to vector<1x128xbf16>
    %4 = tpu.concatenate %1, %3 in 1 : vector<1x128xbf16>, vector<1x128xbf16> -> vector<1x256xbf16>
    %c0_5 = arith.constant 0 : index
    %c0_6 = arith.constant 0 : index
    %5 = vector.load %arg5[%c0_5, %c0_6] : memref<4x1xf32, #tpu.memory_space<vmem>>, vector<4x1xf32>
    %c0_7 = arith.constant 0 : index
    %c0_8 = arith.constant 0 : index
    %c0_9 = arith.constant 0 : index
    %6 = vector.load %arg4[%c0_7, %c0_8, %c0_9] : memref<7x4x1xbf16, #tpu.memory_space<vmem>>, vector<1x4x1xbf16>
    %7 = vector.shape_cast %6 : vector<1x4x1xbf16> to vector<4x1xbf16>
    %8 = vector.extract_strided_slice %4 {offsets = [0, 0], sizes = [1, 128], strides = [1, 1]} : vector<1x256xbf16> to vector<1x128xbf16>
    %cst = arith.constant dense<0.000000e+00> : vector<4x128xf32>
    %9 = tpu.matmul %7, %8, %cst {dimension_numbers = #tpu.dot_dimension_numbers<[1], [0], [0], [1], [0, 0, 1, 1], [], []>} : vector<4x1xbf16>, vector<1x128xbf16>, vector<4x128xf32> -> vector<4x128xf32>
    %c1 = arith.constant 1 : index
    %c0_10 = arith.constant 0 : index
    %c0_11 = arith.constant 0 : index
    %10 = vector.load %arg4[%c1, %c0_10, %c0_11] : memref<7x4x1xbf16, #tpu.memory_space<vmem>>, vector<1x4x1xbf16>
    %11 = vector.shape_cast %10 : vector<1x4x1xbf16> to vector<4x1xbf16>
    %12 = vector.extract_strided_slice %4 {offsets = [0, 1], sizes = [1, 128], strides = [1, 1]} : vector<1x256xbf16> to vector<1x128xbf16>
    %cst_12 = arith.constant dense<0.000000e+00> : vector<4x128xf32>
    %13 = tpu.matmul %11, %12, %cst_12 {dimension_numbers = #tpu.dot_dimension_numbers<[1], [0], [0], [1], [0, 0, 1, 1], [], []>} : vector<4x1xbf16>, vector<1x128xbf16>, vector<4x128xf32> -> vector<4x128xf32>
    %14 = arith.addf %9, %13 : vector<4x128xf32>
    %c2 = arith.constant 2 : index
    %c0_13 = arith.constant 0 : index
    %c0_14 = arith.constant 0 : index
    %15 = vector.load %arg4[%c2, %c0_13, %c0_14] : memref<7x4x1xbf16, #tpu.memory_space<vmem>>, vector<1x4x1xbf16>
    %16 = vector.shape_cast %15 : vector<1x4x1xbf16> to vector<4x1xbf16>
    %17 = vector.extract_strided_slice %4 {offsets = [0, 2], sizes = [1, 128], strides = [1, 1]} : vector<1x256xbf16> to vector<1x128xbf16>
    %cst_15 = arith.constant dense<0.000000e+00> : vector<4x128xf32>
    %18 = tpu.matmul %16, %17, %cst_15 {dimension_numbers = #tpu.dot_dimension_numbers<[1], [0], [0], [1], [0, 0, 1, 1], [], []>} : vector<4x1xbf16>, vector<1x128xbf16>, vector<4x128xf32> -> vector<4x128xf32>
    %19 = arith.addf %14, %18 : vector<4x128xf32>
    %c3 = arith.constant 3 : index
    %c0_16 = arith.constant 0 : index
    %c0_17 = arith.constant 0 : index
    %20 = vector.load %arg4[%c3, %c0_16, %c0_17] : memref<7x4x1xbf16, #tpu.memory_space<vmem>>, vector<1x4x1xbf16>
    %21 = vector.shape_cast %20 : vector<1x4x1xbf16> to vector<4x1xbf16>
    %22 = vector.extract_strided_slice %4 {offsets = [0, 3], sizes = [1, 128], strides = [1, 1]} : vector<1x256xbf16> to vector<1x128xbf16>
    %cst_18 = arith.constant dense<0.000000e+00> : vector<4x128xf32>
    %23 = tpu.matmul %21, %22, %cst_18 {dimension_numbers = #tpu.dot_dimension_numbers<[1], [0], [0], [1], [0, 0, 1, 1], [], []>} : vector<4x1xbf16>, vector<1x128xbf16>, vector<4x128xf32> -> vector<4x128xf32>
    %24 = arith.addf %19, %23 : vector<4x128xf32>
    %c4 = arith.constant 4 : index
    %c0_19 = arith.constant 0 : index
    %c0_20 = arith.constant 0 : index
    %25 = vector.load %arg4[%c4, %c0_19, %c0_20] : memref<7x4x1xbf16, #tpu.memory_space<vmem>>, vector<1x4x1xbf16>
    %26 = vector.shape_cast %25 : vector<1x4x1xbf16> to vector<4x1xbf16>
    %27 = vector.extract_strided_slice %4 {offsets = [0, 4], sizes = [1, 128], strides = [1, 1]} : vector<1x256xbf16> to vector<1x128xbf16>
    %cst_21 = arith.constant dense<0.000000e+00> : vector<4x128xf32>
    %28 = tpu.matmul %26, %27, %cst_21 {dimension_numbers = #tpu.dot_dimension_numbers<[1], [0], [0], [1], [0, 0, 1, 1], [], []>} : vector<4x1xbf16>, vector<1x128xbf16>, vector<4x128xf32> -> vector<4x128xf32>
    %29 = arith.addf %24, %28 : vector<4x128xf32>
    %c5 = arith.constant 5 : index
    %c0_22 = arith.constant 0 : index
    %c0_23 = arith.constant 0 : index
    %30 = vector.load %arg4[%c5, %c0_22, %c0_23] : memref<7x4x1xbf16, #tpu.memory_space<vmem>>, vector<1x4x1xbf16>
    %31 = vector.shape_cast %30 : vector<1x4x1xbf16> to vector<4x1xbf16>
    %32 = vector.extract_strided_slice %4 {offsets = [0, 5], sizes = [1, 128], strides = [1, 1]} : vector<1x256xbf16> to vector<1x128xbf16>
    %cst_24 = arith.constant dense<0.000000e+00> : vector<4x128xf32>
    %33 = tpu.matmul %31, %32, %cst_24 {dimension_numbers = #tpu.dot_dimension_numbers<[1], [0], [0], [1], [0, 0, 1, 1], [], []>} : vector<4x1xbf16>, vector<1x128xbf16>, vector<4x128xf32> -> vector<4x128xf32>
    %34 = arith.addf %29, %33 : vector<4x128xf32>
    %c6 = arith.constant 6 : index
    %c0_25 = arith.constant 0 : index
    %c0_26 = arith.constant 0 : index
    %35 = vector.load %arg4[%c6, %c0_25, %c0_26] : memref<7x4x1xbf16, #tpu.memory_space<vmem>>, vector<1x4x1xbf16>
    %36 = vector.shape_cast %35 : vector<1x4x1xbf16> to vector<4x1xbf16>
    %37 = vector.extract_strided_slice %4 {offsets = [0, 6], sizes = [1, 128], strides = [1, 1]} : vector<1x256xbf16> to vector<1x128xbf16>
    %cst_27 = arith.constant dense<0.000000e+00> : vector<4x128xf32>
    %38 = tpu.matmul %36, %37, %cst_27 {dimension_numbers = #tpu.dot_dimension_numbers<[1], [0], [0], [1], [0, 0, 1, 1], [], []>} : vector<4x1xbf16>, vector<1x128xbf16>, vector<4x128xf32> -> vector<4x128xf32>
    %39 = arith.addf %34, %38 : vector<4x128xf32>
    %40 = vector.broadcast %5 : vector<4x1xf32> to vector<4x128xf32>
    %41 = arith.addf %39, %40 : vector<4x128xf32>
    %cst_28 = arith.constant 0.000000e+00 : f32
    %42 = vector.broadcast %cst_28 : f32 to vector<4x128xf32>
    %43 = arith.cmpf oge, %41, %42 : vector<4x128xf32>
    %cst_29 = arith.constant 2.000000e-01 : f32
    %44 = vector.broadcast %cst_29 : f32 to vector<4x128xf32>
    %45 = arith.mulf %44, %41 : vector<4x128xf32>
    %46 = arith.select %43, %41, %45 : vector<4x128xi1>, vector<4x128xf32>
    %47 = arith.truncf %46 : vector<4x128xf32> to vector<4x128xbf16>
    %c0_30 = arith.constant 0 : index
    %c0_31 = arith.constant 0 : index
    %c0_32 = arith.constant 0 : index
    %48 = vector.load %arg6[%c0_30, %c0_31, %c0_32] : memref<1x4x128xbf16, #tpu.memory_space<vmem>>, vector<1x4x128xbf16>
    %49 = vector.shape_cast %48 : vector<1x4x128xbf16> to vector<4x128xbf16>
    %50 = vector.shape_cast %47 : vector<4x128xbf16> to vector<1x4x128xbf16>
    tpu.vector_store %arg6[%c0_30, %c0_31, %c0_32], %50 {strides = array<i32>} : memref<1x4x128xbf16, #tpu.memory_space<vmem>>, vector<1x4x128xbf16>,
    return
  }
  func.func @transform_0(%arg0: i32, %arg1: i32) -> (i32, i32, i32) {
    %c0_i32 = arith.constant 0 : i32
    %c0_i32_0 = arith.constant 0 : i32
    return %arg0, %c0_i32, %arg1 : i32, i32, i32
  }
  func.func @transform_1(%arg0: i32, %arg1: i32) -> (i32, i32, i32) {
    %c1_i32 = arith.constant 1 : i32
    %0 = arith.addi %arg1, %c1_i32 : i32
    %c1_i32_0 = arith.constant 1 : i32
    %1 = arith.muli %0, %c1_i32_0 : i32
    %c0_i32 = arith.constant 0 : i32
    %c0_i32_1 = arith.constant 0 : i32
    return %arg0, %c0_i32, %1 : i32, i32, i32
  }
  func.func @transform_2(%arg0: i32, %arg1: i32) -> (i32, i32, i32) {
    %c0_i32 = arith.constant 0 : i32
    %c0_i32_0 = arith.constant 0 : i32
    %c0_i32_1 = arith.constant 0 : i32
    %c0_i32_2 = arith.constant 0 : i32
    return %c0_i32, %c0_i32_0, %c0_i32_1 : i32, i32, i32
  }
  func.func @transform_3(%arg0: i32, %arg1: i32) -> (i32, i32) {
    %c0_i32 = arith.constant 0 : i32
    %c0_i32_0 = arith.constant 0 : i32
    %c0_i32_1 = arith.constant 0 : i32
    return %c0_i32, %c0_i32_0 : i32, i32
  }
  func.func @transform_4(%arg0: i32, %arg1: i32) -> (i32, i32, i32) {
    %c0_i32 = arith.constant 0 : i32
    %c0_i32_0 = arith.constant 0 : i32
    return %arg0, %c0_i32, %arg1 : i32, i32, i32
  }
}

module attributes {stable_mosaic.version = 11 : i64} {
  func.func @kernel(%arg0: i32, %arg1: i32, %arg2: memref<1x1x128xbf16, #tpu.memory_space<vmem>>, %arg3: memref<1x1x128xbf16, #tpu.memory_space<vmem>>, %arg4: memref<7x4x1xbf16, #tpu.memory_space<vmem>>, %arg5: memref<4x1xf32, #tpu.memory_space<vmem>>, %arg6: memref<1x4x128xbf16, #tpu.memory_space<vmem>>) attributes {dimension_semantics = [#tpu.dimension_semantics<parallel>, #tpu.dimension_semantics<parallel>], iteration_bounds = array<i64: 3, 4>, scalar_prefetch = 0 : i64, scratch_operands = 0 : i64, tpu.core_type = #tpu.core_type<tc>, window_params = [{transform_indices = @transform_0, window_bounds = array<i64: 1, 1, 128>}, {transform_indices = @transform_1, window_bounds = array<i64: 1, 1, 128>}, {pipeline_mode = #tpu.pipeline_mode<synchronous>, transform_indices = @transform_2, window_bounds = array<i64: 7, 4, 1>}, {pipeline_mode = #tpu.pipeline_mode<synchronous>, transform_indices = @transform_3, window_bounds = array<i64: 4, 1>}, {transform_indices = @transform_4, window_bounds = array<i64: 1, 4, 128>}]} {
    %c0 = arith.constant 0 : index
    %c0_0 = arith.constant 0 : index
    %c0_1 = arith.constant 0 : index
    %0 = vector.load %arg2[%c0, %c0_0, %c0_1] : memref<1x1x128xbf16, #tpu.memory_space<vmem>>, vector<1x1x128xbf16>
    %1 = vector.shape_cast %0 : vector<1x1x128xbf16> to vector<1x128xbf16>
    %c0_2 = arith.constant 0 : index
    %c0_3 = arith.constant 0 : index
    %c0_4 = arith.constant 0 : index
    %2 = vector.load %arg3[%c0_2, %c0_3, %c0_4] : memref<1x1x128xbf16, #tpu.memory_space<vmem>>, vector<1x1x128xbf16>
    %3 = vector.shape_cast %2 : vector<1x1x128xbf16> to vector<1x128xbf16>
    %4 = tpu.concatenate %1, %3 in 1 : vector<1x128xbf16>, vector<1x128xbf16> -> vector<1x256xbf16>
    %c0_5 = arith.constant 0 : index
    %c0_6 = arith.constant 0 : index
    %5 = vector.load %arg5[%c0_5, %c0_6] : memref<4x1xf32, #tpu.memory_space<vmem>>, vector<4x1xf32>
    %c0_7 = arith.constant 0 : index
    %c0_8 = arith.constant 0 : index
    %c0_9 = arith.constant 0 : index
    %6 = vector.load %arg4[%c0_7, %c0_8, %c0_9] : memref<7x4x1xbf16, #tpu.memory_space<vmem>>, vector<1x4x1xbf16>
    %7 = vector.shape_cast %6 : vector<1x4x1xbf16> to vector<4x1xbf16>
    %8 = vector.extract_strided_slice %4 {offsets = [0, 0], sizes = [1, 128], strides = [1, 1]} : vector<1x256xbf16> to vector<1x128xbf16>
    %cst = arith.constant dense<0.000000e+00> : vector<4x128xf32>
    %9 = tpu.matmul %7, %8, %cst {dimension_numbers = #tpu.dot_dimension_numbers<[1], [0], [0], [1], [0, 0, 1, 1], [], []>} : vector<4x1xbf16>, vector<1x128xbf16>, vector<4x128xf32> -> vector<4x128xf32>
    %c1 = arith.constant 1 : index
    %c0_10 = arith.constant 0 : index
    %c0_11 = arith.constant 0 : index
    %10 = vector.load %arg4[%c1, %c0_10, %c0_11] : memref<7x4x1xbf16, #tpu.memory_space<vmem>>, vector<1x4x1xbf16>
    %11 = vector.shape_cast %10 : vector<1x4x1xbf16> to vector<4x1xbf16>
    %12 = vector.extract_strided_slice %4 {offsets = [0, 1], sizes = [1, 128], strides = [1, 1]} : vector<1x256xbf16> to vector<1x128xbf16>
    %cst_12 = arith.constant dense<0.000000e+00> : vector<4x128xf32>
    %13 = tpu.matmul %11, %12, %cst_12 {dimension_numbers = #tpu.dot_dimension_numbers<[1], [0], [0], [1], [0, 0, 1, 1], [], []>} : vector<4x1xbf16>, vector<1x128xbf16>, vector<4x128xf32> -> vector<4x128xf32>
    %14 = arith.addf %9, %13 : vector<4x128xf32>
    %c2 = arith.constant 2 : index
    %c0_13 = arith.constant 0 : index
    %c0_14 = arith.constant 0 : index
    %15 = vector.load %arg4[%c2, %c0_13, %c0_14] : memref<7x4x1xbf16, #tpu.memory_space<vmem>>, vector<1x4x1xbf16>
    %16 = vector.shape_cast %15 : vector<1x4x1xbf16> to vector<4x1xbf16>
    %17 = vector.extract_strided_slice %4 {offsets = [0, 2], sizes = [1, 128], strides = [1, 1]} : vector<1x256xbf16> to vector<1x128xbf16>
    %cst_15 = arith.constant dense<0.000000e+00> : vector<4x128xf32>
    %18 = tpu.matmul %16, %17, %cst_15 {dimension_numbers = #tpu.dot_dimension_numbers<[1], [0], [0], [1], [0, 0, 1, 1], [], []>} : vector<4x1xbf16>, vector<1x128xbf16>, vector<4x128xf32> -> vector<4x128xf32>
    %19 = arith.addf %14, %18 : vector<4x128xf32>
    %c3 = arith.constant 3 : index
    %c0_16 = arith.constant 0 : index
    %c0_17 = arith.constant 0 : index
    %20 = vector.load %arg4[%c3, %c0_16, %c0_17] : memref<7x4x1xbf16, #tpu.memory_space<vmem>>, vector<1x4x1xbf16>
    %21 = vector.shape_cast %20 : vector<1x4x1xbf16> to vector<4x1xbf16>
    %22 = vector.extract_strided_slice %4 {offsets = [0, 3], sizes = [1, 128], strides = [1, 1]} : vector<1x256xbf16> to vector<1x128xbf16>
    %cst_18 = arith.constant dense<0.000000e+00> : vector<4x128xf32>
    %23 = tpu.matmul %21, %22, %cst_18 {dimension_numbers = #tpu.dot_dimension_numbers<[1], [0], [0], [1], [0, 0, 1, 1], [], []>} : vector<4x1xbf16>, vector<1x128xbf16>, vector<4x128xf32> -> vector<4x128xf32>
    %24 = arith.addf %19, %23 : vector<4x128xf32>
    %c4 = arith.constant 4 : index
    %c0_19 = arith.constant 0 : index
    %c0_20 = arith.constant 0 : index
    %25 = vector.load %arg4[%c4, %c0_19, %c0_20] : memref<7x4x1xbf16, #tpu.memory_space<vmem>>, vector<1x4x1xbf16>
    %26 = vector.shape_cast %25 : vector<1x4x1xbf16> to vector<4x1xbf16>
    %27 = vector.extract_strided_slice %4 {offsets = [0, 4], sizes = [1, 128], strides = [1, 1]} : vector<1x256xbf16> to vector<1x128xbf16>
    %cst_21 = arith.constant dense<0.000000e+00> : vector<4x128xf32>
    %28 = tpu.matmul %26, %27, %cst_21 {dimension_numbers = #tpu.dot_dimension_numbers<[1], [0], [0], [1], [0, 0, 1, 1], [], []>} : vector<4x1xbf16>, vector<1x128xbf16>, vector<4x128xf32> -> vector<4x128xf32>
    %29 = arith.addf %24, %28 : vector<4x128xf32>
    %c5 = arith.constant 5 : index
    %c0_22 = arith.constant 0 : index
    %c0_23 = arith.constant 0 : index
    %30 = vector.load %arg4[%c5, %c0_22, %c0_23] : memref<7x4x1xbf16, #tpu.memory_space<vmem>>, vector<1x4x1xbf16>
    %31 = vector.shape_cast %30 : vector<1x4x1xbf16> to vector<4x1xbf16>
    %32 = vector.extract_strided_slice %4 {offsets = [0, 5], sizes = [1, 128], strides = [1, 1]} : vector<1x256xbf16> to vector<1x128xbf16>
    %cst_24 = arith.constant dense<0.000000e+00> : vector<4x128xf32>
    %33 = tpu.matmul %31, %32, %cst_24 {dimension_numbers = #tpu.dot_dimension_numbers<[1], [0], [0], [1], [0, 0, 1, 1], [], []>} : vector<4x1xbf16>, vector<1x128xbf16>, vector<4x128xf32> -> vector<4x128xf32>
    %34 = arith.addf %29, %33 : vector<4x128xf32>
    %c6 = arith.constant 6 : index
    %c0_25 = arith.constant 0 : index
    %c0_26 = arith.constant 0 : index
    %35 = vector.load %arg4[%c6, %c0_25, %c0_26] : memref<7x4x1xbf16, #tpu.memory_space<vmem>>, vector<1x4x1xbf16>
    %36 = vector.shape_cast %35 : vector<1x4x1xbf16> to vector<4x1xbf16>
    %37 = vector.extract_strided_slice %4 {offsets = [0, 6], sizes = [1, 128], strides = [1, 1]} : vector<1x256xbf16> to vector<1x128xbf16>
    %cst_27 = arith.constant dense<0.000000e+00> : vector<4x128xf32>
    %38 = tpu.matmul %36, %37, %cst_27 {dimension_numbers = #tpu.dot_dimension_numbers<[1], [0], [0], [1], [0, 0, 1, 1], [], []>} : vector<4x1xbf16>, vector<1x128xbf16>, vector<4x128xf32> -> vector<4x128xf32>
    %39 = arith.addf %34, %38 : vector<4x128xf32>
    %40 = vector.broadcast %5 : vector<4x1xf32> to vector<4x128xf32>
    %41 = arith.addf %39, %40 : vector<4x128xf32>
    %cst_28 = arith.constant 0.000000e+00 : f32
    %42 = vector.broadcast %cst_28 : f32 to vector<4x128xf32>
    %43 = arith.cmpf oge, %41, %42 : vector<4x128xf32>
    %cst_29 = arith.constant 2.000000e-01 : f32
    %44 = vector.broadcast %cst_29 : f32 to vector<4x128xf32>
    %45 = arith.mulf %44, %41 : vector<4x128xf32>
    %46 = arith.select %43, %41, %45 : vector<4x128xi1>, vector<4x128xf32>
    %47 = arith.truncf %46 : vector<4x128xf32> to vector<4x128xbf16>
    %c0_30 = arith.constant 0 : index
    %c0_31 = arith.constant 0 : index
    %c0_32 = arith.constant 0 : index
    %48 = vector.load %arg6[%c0_30, %c0_31, %c0_32] : memref<1x4x128xbf16, #tpu.memory_space<vmem>>, vector<1x4x128xbf16>
    %49 = vector.shape_cast %48 : vector<1x4x128xbf16> to vector<4x128xbf16>
    %50 = vector.shape_cast %47 : vector<4x128xbf16> to vector<1x4x128xbf16>
    tpu.vector_store %arg6[%c0_30, %c0_31, %c0_32], %50 {strides = array<i32>} : memref<1x4x128xbf16, #tpu.memory_space<vmem>>, vector<1x4x128xbf16>,
    return
  }
  func.func @transform_0(%arg0: i32, %arg1: i32) -> (i32, i32, i32) {
    %c0_i32 = arith.constant 0 : i32
    %c0_i32_0 = arith.constant 0 : i32
    return %arg0, %c0_i32, %arg1 : i32, i32, i32
  }
  func.func @transform_1(%arg0: i32, %arg1: i32) -> (i32, i32, i32) {
    %c1_i32 = arith.constant 1 : i32
    %0 = arith.addi %arg1, %c1_i32 : i32
    %c1_i32_0 = arith.constant 1 : i32
    %1 = arith.muli %0, %c1_i32_0 : i32
    %c0_i32 = arith.constant 0 : i32
    %c0_i32_1 = arith.constant 0 : i32
    return %arg0, %c0_i32, %1 : i32, i32, i32
  }
  func.func @transform_2(%arg0: i32, %arg1: i32) -> (i32, i32, i32) {
    %c0_i32 = arith.constant 0 : i32
    %c0_i32_0 = arith.constant 0 : i32
    %c0_i32_1 = arith.constant 0 : i32
    %c0_i32_2 = arith.constant 0 : i32
    return %c0_i32, %c0_i32_0, %c0_i32_1 : i32, i32, i32
  }
  func.func @transform_3(%arg0: i32, %arg1: i32) -> (i32, i32) {
    %c0_i32 = arith.constant 0 : i32
    %c0_i32_0 = arith.constant 0 : i32
    %c0_i32_1 = arith.constant 0 : i32
    return %c0_i32, %c0_i32_0 : i32, i32
  }
  func.func @transform_4(%arg0: i32, %arg1: i32) -> (i32, i32, i32) {
    %c0_i32 = arith.constant 0 : i32
    %c0_i32_0 = arith.constant 0 : i32
    return %arg0, %c0_i32, %arg1 : i32, i32, i32
  }
}

</mosaic_0001>

<bundles_post_ra>
// kernel: tpu_custom_call.1
= control target key start
LH: loop header
LB: loop body
LE: loop exit
PB: predicated region body
PF: predicated region fallthrough
CT: control target
= control target key end

     0   :  { %9 = vsyncpa [#allocation3], 0  ;;  %s958_s0 = inlined_call_operand.vmem [shape: bf16[3,1,640], index: 0, kind: input, shape index: {}]   ;;  %s959_s1 = inlined_call_operand.vmem [shape: bf16[3,1,640], index: 1, kind: input, shape index: {}]   ;;  %s960_s2 = inlined_call_operand.vmem [shape: bf16[7,4,1], index: 2, kind: input, shape index: {}]   ;;  %s961_s3 = inlined_call_operand.vmem [shape: f32[4,1], index: 3, kind: input, shape index: {}]   ;;  %s962_s4 = inlined_call_operand.hbm [shape: bf16[3,4,512], index: 4, kind: output, shape index: {}]  }
   0x1   :  { %11 = vsyncpa [#allocation3 + $0x1], 0  ;;  %s801_s15 = smov 0   ;;  %s803_s16 = smov 0  }
   0x2   :  { %s805_s17 = smov 0   ;;  %s807_s18 = smov 0  }
   0x3   :  { %s809_s19 = smov 0   ;;  %s811_s20 = smov 0  }
   0x4   :  { %s813_s21 = smov 0   ;;  %s815_s22 = smov 0  }
   0x5 LB: > { %s569_s23 = sadd.s32 4294967295, %s767_s22   ;;  %s570_s24 = sadd.s32 4294967294, %s767_s22   ;;  %s767_s22 = sphi %s815_s22, %s17_s22   ;;  %s763_s21 = sphi %s813_s21, %s974_s21   ;;  %s759_s20 = sphi %s811_s20, %s973_s20   ;;  %s755_s19 = sphi %s809_s19, %s972_s19   ;;  %s751_s18 = sphi %s807_s18, %s971_s18   ;;  %s747_s17 = sphi %s805_s17, %s970_s17   ;;  %s743_s16 = sphi %s803_s16, %s969_s16   ;;  %s739_s15 = sphi %s801_s15, %s968_s15  }
   0x6   : > { %s26_s25 = sadd.s32 1, %s759_s20  ;;  %s29_s26 = sadd.s32 1, %s763_s21 }
   0x7   : > { %p27_p0 = scmp.ge.s32.totalorder %s26_s25, 4  ;;  %p148_p1 = scmp.ne.s32.totalorder %s747_s17, %s743_s16 }
   0x8   : > { %p149_p2 = scmp.eq.s32.totalorder %s569_s23, 11  ;;  %p154_p5 = scmp.ne.s32.totalorder %s743_s16, %s739_s15 }
   0x9   : > { %s976_s25 = smov (%p27_p0, %s26_s25), 0  ;;  %s978_s26 = smov (!%p27_p0, %s29_s26), %s763_s21 }
   0xa   : > { %s134_s27 = ssub.s32 %s759_s20, %s976_s25  ;;  %p852_p3 = por %p149_p2, %p148_p1 }
   0xb   : > { %p31_p4 = scmp.ge.s32.totalorder %s978_s26, 3  ;;  %p155_p6 = scmp.eq.s32.totalorder %s570_s24, 11 }
   0xc   : > { %p573_p7 = scmp.ge.s32.totalorder %s767_s22, 1  ;;  %p201_p9 = scmp.lt.s32.totalorder %s767_s22, 13 }
   0xd   : > { %s980_s26 = smov (%p31_p4, %s978_s26), 0  ;;  %p861_p8 = por %p155_p6, %p154_p5 }
   0xe   : > { %965 = sst [smem:[#allocation5_spill]] %s980_s26  ;;  %s133_s30 = ssub.s32 %s763_s21, %s980_s26 }
   0xf   : > { %s138_s5 = sadd.s32 1, %s747_s17  ;;  %s135_s6 = sor.u32 %s134_s27, %s133_s30 }
  0x10   : > { %p202_p10 = pnand %p573_p7, %p201_p9  ;;  %p136_p11 = scmp.eq.s32.totalorder %s135_s6, 0 }
  0x11   : > { %p237_p12 = scmp.lt.s32.totalorder (!%p202_p10), %s755_s19, 2  ;;  %p239_p13 = scmp.lt.s32.totalorder (!%p202_p10), %s751_s18, 4 }
  0x12   : > { %s870_s7 = scalar_select %p136_p11, %s747_s17, %s138_s5  }
  0x13   : > { %205 = sbr.rel (%p202_p10) target bundleno = 320 (0x140), region = 36  ;;  %s244_s11 = sadd.s32 (!%p202_p10), 1, %s751_s18 }
  0x14   : > { %p247_p0 = scmp.lt.s32.totalorder (!%p202_p10), %s244_s11, 4  ;;  %s769_s24 = smov (!%p202_p10), 127  }
  0x15   : > { %s770_s27 = smov (!%p202_p10), 126   ;;  %s771_s5 = smov (!%p202_p10), 125  }
  0x16   : > { %s774_s13 = smov (!%p202_p10), 123   ;;  %s234_s14 = sand.u32 (!%p202_p10), 1, %s743_s16  }
  0x18   : > { %s238_s8 = scalar_select %p237_p12, %s755_s19, 2  ;;  %vm272_vm0 = vcmask 1040384   ;;  %v775_v2 = vmov 0   ;;  %vm268_vm1 = vcmask 7168   ;;  %v257_v6 = vld [vmem:[%s960_s2] sm:$0x3] }
  0x19   : > { %s240_s9 = scalar_select %p239_p13, %s751_s18, 4  ;;  %672 = vset.pattern.permute.xlu0 %v775_v2  ;;  %v274_v3 = vsel %vm272_vm0, 65535, %v775_v2  ;;  %vm344_vm2 = vcmask 1022976   ;;  %v580_v10 = vld [vmem:[%s960_s2 + $0x6] sm:$0x3]  ;;  %vm266_vm3 = vcmask 1039360  }
  0x1a   : > { %s593_s10 = smul.u32 5, %s238_s8  ;;  %s982_s11 = smov (!%p247_p0, %s244_s11), 4  ;;  %v256_v13 = vld [vmem:[%s961_s3] sm:$0xf]  ;;  %vm316_vm4 = vcmask 1031168   ;;  %vm428_vm5 = vcmask 998400  }
  0x1b   : > { %v578_v20 = vld [vmem:[%s960_s2 + $0x4] sm:$0x3]  ;;  %v575_v21 = vld [vmem:[%s960_s2 + $0x2] sm:$0x3]  ;;  %vm372_vm6 = vcmask 1014784   ;;  %vm400_vm7 = vcmask 1006592  }
  0x1c   : > { %s242_s12 = sadd.s32 %s593_s10, %s240_s9  ;;  %s250_s30 = sadd.s32 %s593_s10, %s982_s11  ;;  %v586_v34 = vld [vmem:[%s960_s2 + $0xc] sm:$0x3]  ;;  %v582_v35 = vld [vmem:[%s960_s2 + $0x8] sm:$0x3]  ;;  %v584_v36 = vld [vmem:[%s960_s2 + $0xa] sm:$0x3] }
  0x1d   : > { %s243_s23 = scalar_lea.vmem %s958_s0, %s242_s12  ;;  %s251_s8 = scalar_lea.vmem %s959_s1, %s250_s30 }
  0x1e   : > { %v254_v0 = vld [vmem:[%s243_s23] sm:$0x1]  ;;  %s772_s9 = smov 122   ;;  %s773_s12 = smov 124  }
  0x1f   : > { %262 = vrot.lane.b32.xlu1 %v254_v0, %s769_s24  ;;  %312 = vrot.lane.b32.xlu0 %v254_v0, %s770_s27  ;;  %v255_v1 = vld [vmem:[%s251_s8] sm:$0x1]  ;;  %v295_v4 = vand.u32 %v274_v3, %v254_v0  ;;  %s589_s11 = sshll.u32 %s755_s19, 2 }
  0x20   : > { %340 = vrot.lane.b32.xlu2 %v254_v0, %s771_s5  ;;  %s472_s23 = sadd.s32 %s751_s18, %s589_s11  ;;  %s462_s18 = scalar_lea.sflag [#allocation3], %s234_s14 }
  0x21   : > { %304 = vmatpush.bf16.msra.mxu1 %v295_v4  ;;  %s693_s11 = scalar_lea.hbm %s962_s4, 24 }
  0x24   : > { %577 = vmatmul.msk.bf16.vlgmr.msra.gmra.mxu1 %vm268_vm1, %v257_v6 }
  0x27   : > { %264 = vrot.lane.b32.xlu1 %v255_v1, %s769_s24  ;;  %314 = vrot.lane.b32.xlu0 %v255_v1, %s770_s27  ;;  %s574_s24 = sshll.u32 %s234_s14, 1  ;;  %s590_s27 = sshll.u32 %s472_s23, 1 }
  0x28   : > { %342 = vrot.lane.b32.xlu2 %v255_v1, %s771_s5  ;;  %s474_s6 = scalar_lea.hbm %s962_s4, %s590_s27  ;;  %s236_s19 = scalar_lea.vmem [#allocation2], %s574_s24 }
  0x29   : > { %s476_s8 = sshll.u32 %s236_s19, 4  ;;  %s477_s8 = int_to_ptr.vmem [resolvable:$true] %s476_s8 }
  0x2f   : > { %426 = vrot.lane.b32.xlu1 %v255_v1, %s772_s9  ;;  %424 = vrot.lane.b32.xlu0 %v254_v0, %s772_s9  ;;  %s478_s9 = sshll.u32 %s474_s6, 4  ;;  %s479_s9 = int_to_ptr.hbm [resolvable:$true] %s478_s9 }
  0x30   : > { %368 = vrot.lane.b32.xlu2 %v254_v0, %s773_s12 }
  0x37   : > { %370 = vrot.lane.b32.xlu0 %v255_v1, %s773_s12  ;;  %396 = vrot.lane.b32.xlu1 %v254_v0, %s774_s13  ;;  %s687_s12 = sshra.s32 %s479_s9, 4  ;;  %s688_s12 = int_to_ptr.hbm [resolvable:$true] %s687_s12 }
  0x38   : > { %398 = vrot.lane.b32.xlu2 %v255_v1, %s774_s13  ;;  %s689_s13 = scalar_lea.hbm %s688_s12, 2  ;;  %p694_p5 = scmp.lt.s32.totalorder %s688_s12, %s962_s4 }
  0x39   : > { %p690_p1 = scmp.ne.s32.totalorder %s688_s12, %s689_s13  ;;  %p695_p6 = scmp.lt.s32.totalorder %s693_s11, %s689_s13 }
  0x3b   : > { %p691_p2 = pnand %p690_p1, %p852_p3  ;;  %p696_p7 = por %p695_p6, %p694_p5 }
  0x3d   : > { %p692_p4 = pneg %p691_p2 }
  0x3f   : > { %452 = vperm.xlu0 %672, %v256_v13   ;;  %p697_p9 = pnand %p696_p7, %p692_p4 }
  0x7a   : > { %v341_v5 = vpop.permute.xlu2 %340 }
  0x82   : > { %v343_v7 = vpop.permute.xlu2 %342 }
  0x83   : > { %v345_v8 = vsel %vm344_vm2, %v341_v5, %v343_v7 }
  0x84   : > { %v350_v9 = vand.u32 %v345_v8, %v274_v3 }
  0x86   : > { %359 = vmatpush.bf16.msra.mxu3 %v350_v9 }
  0x89   : > { %581 = vmatmul.msk.bf16.vlgmr.msra.gmra.mxu3 %vm268_vm1, %v580_v10 }
  0x8a   : > { %v369_v22 = vpop.permute.xlu2 %368 }
  0x91   : > { %v263_v11 = vpop.permute.xlu1 %262  ;;  %v313_v12 = vpop.permute.xlu0 %312 }
  0x92   : > { %v399_v27 = vpop.permute.xlu2 %398 }
  0x99   : > { %v265_v14 = vpop.permute.xlu1 %264  ;;  %v315_v15 = vpop.permute.xlu0 %314 }
  0x9a   : > { %v267_v16 = vsel %vm266_vm3, %v263_v11, %v265_v14  ;;  %v317_v17 = vsel %vm316_vm4, %v313_v12, %v315_v15 }
  0x9b   : > { %v276_v18 = vand.u32 %v274_v3, %v267_v16  ;;  %v322_v19 = vand.u32 %v317_v17, %v274_v3 }
  0x9d   : > { %285 = vmatpush.bf16.msra.mxu0 %v276_v18  ;;  %331 = vmatpush.bf16.msra.mxu2 %v322_v19 }
  0xa0   : > { %579 = vmatmul.msk.bf16.vlgmr.msra.gmra.mxu2 %vm268_vm1, %v578_v20  ;;  %576 = vmatmul.msk.bf16.vlgmr.msra.gmra.mxu0 %vm268_vm1, %v575_v21 }
  0xa1   : > { %v427_v23 = vpop.permute.xlu1 %426  ;;  %v425_v24 = vpop.permute.xlu0 %424 }
  0xa2   : > { %v429_v25 = vsel %vm428_vm5, %v425_v24, %v427_v23  ;;  %v306_v37 = vpop.f32.mrf.mxu1 }
  0xa3   : > { %v434_v26 = vand.u32 %v429_v25, %v274_v3 }
  0xa5   : > { %443 = vmatpush.bf16.msrb.mxu2 %v434_v26 }
  0xa9   : > { %v371_v28 = vpop.permute.xlu0 %370  ;;  %v397_v29 = vpop.permute.xlu1 %396 }
  0xaa   : > { %v373_v30 = vsel %vm372_vm6, %v369_v22, %v371_v28  ;;  %v401_v31 = vsel %vm400_vm7, %v397_v29, %v399_v27  ;;  %v308_v38 = vpop.f32.mrf.mxu1 }
  0xab   : > { %v378_v32 = vand.u32 %v373_v30, %v274_v3  ;;  %v406_v33 = vand.u32 %v401_v31, %v274_v3 }
  0xad   : > { %387 = vmatpush.bf16.msrb.mxu0 %v378_v32  ;;  %415 = vmatpush.bf16.msrb.mxu1 %v406_v33 }
  0xb0   : > { %587 = vmatmul.msk.bf16.vlgmr.msrb.gmra.mxu2 %vm268_vm1, %v586_v34  ;;  %583 = vmatmul.msk.bf16.vlgmr.msrb.gmra.mxu0 %vm268_vm1, %v582_v35 }
  0xb1   : > { %585 = vmatmul.msk.bf16.vlgmr.msrb.gmra.mxu1 %vm268_vm1, %v584_v36  ;;  %v453_v53 = vpop.permute.xlu0 %452 }
 0x10c   : > { %v361_v39 = vpop.f32.mrf.mxu3 }
 0x114   : > { %v363_v40 = vpop.f32.mrf.mxu3 }
 0x11d   : > { %v287_v41 = vpop.f32.mrf.mxu0 }
 0x11e   : > { %v307_v44 = vadd.f32 %v306_v37, %v287_v41 }
 0x123   : > { %v333_v42 = vpop.f32.mrf.mxu2 }
 0x124   : > { %v337_v45 = vadd.f32 %v333_v42, %v307_v44 }
 0x125   : > { %v289_v43 = vpop.f32.mrf.mxu0 }
 0x126   : > { %v365_v47 = vadd.f32 %v361_v39, %v337_v45 }
 0x12b   : > { %v335_v46 = vpop.f32.mrf.mxu2 }
 0x12d   : > { %v389_v48 = vpop.f32.mrf.mxu0 }
 0x12e   : > { %v393_v49 = vadd.f32 %v389_v48, %v365_v47  ;;  %v417_v50 = vpop.f32.mrf.mxu1 }
 0x130   : > { %v421_v51 = vadd.f32 %v417_v50, %v393_v49 }
 0x133   : > { %v445_v52 = vpop.f32.mrf.mxu2 }
 0x134   : > { %v449_v54 = vadd.f32 %v445_v52, %v421_v51 }
 0x135   : > { %v391_v55 = vpop.f32.mrf.mxu0 }
 0x136   : > { %v455_v56 = vadd.f32 %v453_v53, %v449_v54  ;;  %v419_v57 = vpop.f32.mrf.mxu1 }
 0x138   : > { %vm456_vm8 = vcmp.ge.f32.partialorder %v455_v56, 0.0  ;;  %v457_v58 = vmul.f32 0.2, %v455_v56 }
 0x13a   : > { %v458_v59 = vsel %vm456_vm8, %v455_v56, %v457_v58 }
 0x13b   : > { %v459_v60 = vpack.c.bf16 %v458_v59, %v458_v59  ;;  %v447_v61 = vpop.f32.mrf.mxu2 }
 0x13d   : > { %460 = vst [vmem:[%s236_s19] sm:$0x3] %v459_v60 }
 0x13e   : > { %700 = shalt.err (!%p697_p9)
}
 0x13f   : > { %594 = dma.vmem_to_hbm [thread:$0]  (%p852_p3), %s477_s8, 32, %s479_s9, %s462_s18  }
 0x140 PF: > { %p600_p10 = scmp.ge.s32.totalorder %s767_s22, 2  ;;  %s490_s14 = sand.u32 1, %s739_s15  }
 0x141   : > { %s491_s27 = scalar_lea.sflag [#allocation3], %s490_s14 }
 0x142   : > { %p597_p11 = pnand %p600_p10, %p861_p8 }
 0x144   : > { %p598_p12 = pneg %p597_p11 }
 0x146   : > { %734 = dma.done.wait (%p598_p12), %s491_s27, 32  }
 0x147   : > { %736 = vsyncadd (%p598_p12), %s491_s27, 4294967264  ;;  %s17_s22 = sadd.s32 1, %s767_s22   ;;  %s967_s28 = sld [smem:[#allocation5_spill]] }
 0x148   : > { %p14_p13 = scmp.ge.s32.totalorder %s17_s22, 14   ;;  %s968_s15 = smov %s743_s16 }
 0x149   : > { %s969_s16 = smov %s747_s17  ;;  %s970_s17 = smov %s870_s7 }
 0x14a   : > { %s971_s18 = smov %s759_s20  ;;  %s972_s19 = smov %s763_s21 }
 0x14b   : > { %s973_s20 = smov %s976_s25  ;;  %16 = sbr.rel (!%p14_p13) target bundleno = 5 (0x5), region = 80 }
 0x14d   : > { %s974_s21 = smov %s967_s28 }
 0x150   :  { %497 = vsyncpa [#allocation3], 1 }
 0x151   :  { %499 = vsyncpa [#allocation3 + $0x1], 1 }

// kernel: tpu_custom_call.1
= control target key start
LH: loop header
LB: loop body
LE: loop exit
PB: predicated region body
PF: predicated region fallthrough
CT: control target
= control target key end

     0   :  { %9 = vsyncpa [#allocation3], 0  ;;  %s958_s0 = inlined_call_operand.vmem [shape: bf16[3,1,640], index: 0, kind: input, shape index: {}]   ;;  %s959_s1 = inlined_call_operand.vmem [shape: bf16[3,1,640], index: 1, kind: input, shape index: {}]   ;;  %s960_s2 = inlined_call_operand.vmem [shape: bf16[7,4,1], index: 2, kind: input, shape index: {}]   ;;  %s961_s3 = inlined_call_operand.vmem [shape: f32[4,1], index: 3, kind: input, shape index: {}]   ;;  %s962_s4 = inlined_call_operand.hbm [shape: bf16[3,4,512], index: 4, kind: output, shape index: {}]  }
   0x1   :  { %11 = vsyncpa [#allocation3 + $0x1], 0  ;;  %s801_s15 = smov 0   ;;  %s803_s16 = smov 0  }
   0x2   :  { %s805_s17 = smov 0   ;;  %s807_s18 = smov 0  }
   0x3   :  { %s809_s19 = smov 0   ;;  %s811_s20 = smov 0  }
   0x4   :  { %s813_s21 = smov 0   ;;  %s815_s22 = smov 0  }
   0x5 LB: > { %s569_s23 = sadd.s32 4294967295, %s767_s22   ;;  %s570_s24 = sadd.s32 4294967294, %s767_s22   ;;  %s767_s22 = sphi %s815_s22, %s17_s22   ;;  %s763_s21 = sphi %s813_s21, %s974_s21   ;;  %s759_s20 = sphi %s811_s20, %s973_s20   ;;  %s755_s19 = sphi %s809_s19, %s972_s19   ;;  %s751_s18 = sphi %s807_s18, %s971_s18   ;;  %s747_s17 = sphi %s805_s17, %s970_s17   ;;  %s743_s16 = sphi %s803_s16, %s969_s16   ;;  %s739_s15 = sphi %s801_s15, %s968_s15  }
   0x6   : > { %s26_s25 = sadd.s32 1, %s759_s20  ;;  %s29_s26 = sadd.s32 1, %s763_s21 }
   0x7   : > { %p27_p0 = scmp.ge.s32.totalorder %s26_s25, 4  ;;  %p148_p1 = scmp.ne.s32.totalorder %s747_s17, %s743_s16 }
   0x8   : > { %p149_p2 = scmp.eq.s32.totalorder %s569_s23, 11  ;;  %p154_p5 = scmp.ne.s32.totalorder %s743_s16, %s739_s15 }
   0x9   : > { %s976_s25 = smov (%p27_p0, %s26_s25), 0  ;;  %s978_s26 = smov (!%p27_p0, %s29_s26), %s763_s21 }
   0xa   : > { %s134_s27 = ssub.s32 %s759_s20, %s976_s25  ;;  %p852_p3 = por %p149_p2, %p148_p1 }
   0xb   : > { %p31_p4 = scmp.ge.s32.totalorder %s978_s26, 3  ;;  %p155_p6 = scmp.eq.s32.totalorder %s570_s24, 11 }
   0xc   : > { %p573_p7 = scmp.ge.s32.totalorder %s767_s22, 1  ;;  %p201_p9 = scmp.lt.s32.totalorder %s767_s22, 13 }
   0xd   : > { %s980_s26 = smov (%p31_p4, %s978_s26), 0  ;;  %p861_p8 = por %p155_p6, %p154_p5 }
   0xe   : > { %965 = sst [smem:[#allocation5_spill]] %s980_s26  ;;  %s133_s30 = ssub.s32 %s763_s21, %s980_s26 }
   0xf   : > { %s138_s5 = sadd.s32 1, %s747_s17  ;;  %s135_s6 = sor.u32 %s134_s27, %s133_s30 }
  0x10   : > { %p202_p10 = pnand %p573_p7, %p201_p9  ;;  %p136_p11 = scmp.eq.s32.totalorder %s135_s6, 0 }
  0x11   : > { %p237_p12 = scmp.lt.s32.totalorder (!%p202_p10), %s755_s19, 2  ;;  %p239_p13 = scmp.lt.s32.totalorder (!%p202_p10), %s751_s18, 4 }
  0x12   : > { %s870_s7 = scalar_select %p136_p11, %s747_s17, %s138_s5  }
  0x13   : > { %205 = sbr.rel (%p202_p10) target bundleno = 320 (0x140), region = 36  ;;  %s244_s11 = sadd.s32 (!%p202_p10), 1, %s751_s18 }
  0x14   : > { %p247_p0 = scmp.lt.s32.totalorder (!%p202_p10), %s244_s11, 4  ;;  %s769_s24 = smov (!%p202_p10), 127  }
  0x15   : > { %s770_s27 = smov (!%p202_p10), 126   ;;  %s771_s5 = smov (!%p202_p10), 125  }
  0x16   : > { %s774_s13 = smov (!%p202_p10), 123   ;;  %s234_s14 = sand.u32 (!%p202_p10), 1, %s743_s16  }
  0x18   : > { %s238_s8 = scalar_select %p237_p12, %s755_s19, 2  ;;  %vm272_vm0 = vcmask 1040384   ;;  %v775_v2 = vmov 0   ;;  %vm268_vm1 = vcmask 7168   ;;  %v257_v6 = vld [vmem:[%s960_s2] sm:$0x3] }
  0x19   : > { %s240_s9 = scalar_select %p239_p13, %s751_s18, 4  ;;  %672 = vset.pattern.permute.xlu0 %v775_v2  ;;  %v274_v3 = vsel %vm272_vm0, 65535, %v775_v2  ;;  %vm344_vm2 = vcmask 1022976   ;;  %v580_v10 = vld [vmem:[%s960_s2 + $0x6] sm:$0x3]  ;;  %vm266_vm3 = vcmask 1039360  }
  0x1a   : > { %s593_s10 = smul.u32 5, %s238_s8  ;;  %s982_s11 = smov (!%p247_p0, %s244_s11), 4  ;;  %v256_v13 = vld [vmem:[%s961_s3] sm:$0xf]  ;;  %vm316_vm4 = vcmask 1031168   ;;  %vm428_vm5 = vcmask 998400  }
  0x1b   : > { %v578_v20 = vld [vmem:[%s960_s2 + $0x4] sm:$0x3]  ;;  %v575_v21 = vld [vmem:[%s960_s2 + $0x2] sm:$0x3]  ;;  %vm372_vm6 = vcmask 1014784   ;;  %vm400_vm7 = vcmask 1006592  }
  0x1c   : > { %s242_s12 = sadd.s32 %s593_s10, %s240_s9  ;;  %s250_s30 = sadd.s32 %s593_s10, %s982_s11  ;;  %v586_v34 = vld [vmem:[%s960_s2 + $0xc] sm:$0x3]  ;;  %v582_v35 = vld [vmem:[%s960_s2 + $0x8] sm:$0x3]  ;;  %v584_v36 = vld [vmem:[%s960_s2 + $0xa] sm:$0x3] }
  0x1d   : > { %s243_s23 = scalar_lea.vmem %s958_s0, %s242_s12  ;;  %s251_s8 = scalar_lea.vmem %s959_s1, %s250_s30 }
  0x1e   : > { %v254_v0 = vld [vmem:[%s243_s23] sm:$0x1]  ;;  %s772_s9 = smov 122   ;;  %s773_s12 = smov 124  }
  0x1f   : > { %262 = vrot.lane.b32.xlu1 %v254_v0, %s769_s24  ;;  %312 = vrot.lane.b32.xlu0 %v254_v0, %s770_s27  ;;  %v255_v1 = vld [vmem:[%s251_s8] sm:$0x1]  ;;  %v295_v4 = vand.u32 %v274_v3, %v254_v0  ;;  %s589_s11 = sshll.u32 %s755_s19, 2 }
  0x20   : > { %340 = vrot.lane.b32.xlu2 %v254_v0, %s771_s5  ;;  %s472_s23 = sadd.s32 %s751_s18, %s589_s11  ;;  %s462_s18 = scalar_lea.sflag [#allocation3], %s234_s14 }
  0x21   : > { %304 = vmatpush.bf16.msra.mxu1 %v295_v4  ;;  %s693_s11 = scalar_lea.hbm %s962_s4, 24 }
  0x24   : > { %577 = vmatmul.msk.bf16.vlgmr.msra.gmra.mxu1 %vm268_vm1, %v257_v6 }
  0x27   : > { %264 = vrot.lane.b32.xlu1 %v255_v1, %s769_s24  ;;  %314 = vrot.lane.b32.xlu0 %v255_v1, %s770_s27  ;;  %s574_s24 = sshll.u32 %s234_s14, 1  ;;  %s590_s27 = sshll.u32 %s472_s23, 1 }
  0x28   : > { %342 = vrot.lane.b32.xlu2 %v255_v1, %s771_s5  ;;  %s474_s6 = scalar_lea.hbm %s962_s4, %s590_s27  ;;  %s236_s19 = scalar_lea.vmem [#allocation2], %s574_s24 }
  0x29   : > { %s476_s8 = sshll.u32 %s236_s19, 4  ;;  %s477_s8 = int_to_ptr.vmem [resolvable:$true] %s476_s8 }
  0x2f   : > { %426 = vrot.lane.b32.xlu1 %v255_v1, %s772_s9  ;;  %424 = vrot.lane.b32.xlu0 %v254_v0, %s772_s9  ;;  %s478_s9 = sshll.u32 %s474_s6, 4  ;;  %s479_s9 = int_to_ptr.hbm [resolvable:$true] %s478_s9 }
  0x30   : > { %368 = vrot.lane.b32.xlu2 %v254_v0, %s773_s12 }
  0x37   : > { %370 = vrot.lane.b32.xlu0 %v255_v1, %s773_s12  ;;  %396 = vrot.lane.b32.xlu1 %v254_v0, %s774_s13  ;;  %s687_s12 = sshra.s32 %s479_s9, 4  ;;  %s688_s12 = int_to_ptr.hbm [resolvable:$true] %s687_s12 }
  0x38   : > { %398 = vrot.lane.b32.xlu2 %v255_v1, %s774_s13  ;;  %s689_s13 = scalar_lea.hbm %s688_s12, 2  ;;  %p694_p5 = scmp.lt.s32.totalorder %s688_s12, %s962_s4 }
  0x39   : > { %p690_p1 = scmp.ne.s32.totalorder %s688_s12, %s689_s13  ;;  %p695_p6 = scmp.lt.s32.totalorder %s693_s11, %s689_s13 }
  0x3b   : > { %p691_p2 = pnand %p690_p1, %p852_p3  ;;  %p696_p7 = por %p695_p6, %p694_p5 }
  0x3d   : > { %p692_p4 = pneg %p691_p2 }
  0x3f   : > { %452 = vperm.xlu0 %672, %v256_v13   ;;  %p697_p9 = pnand %p696_p7, %p692_p4 }
  0x7a   : > { %v341_v5 = vpop.permute.xlu2 %340 }
  0x82   : > { %v343_v7 = vpop.permute.xlu2 %342 }
  0x83   : > { %v345_v8 = vsel %vm344_vm2, %v341_v5, %v343_v7 }
  0x84   : > { %v350_v9 = vand.u32 %v345_v8, %v274_v3 }
  0x86   : > { %359 = vmatpush.bf16.msra.mxu3 %v350_v9 }
  0x89   : > { %581 = vmatmul.msk.bf16.vlgmr.msra.gmra.mxu3 %vm268_vm1, %v580_v10 }
  0x8a   : > { %v369_v22 = vpop.permute.xlu2 %368 }
  0x91   : > { %v263_v11 = vpop.permute.xlu1 %262  ;;  %v313_v12 = vpop.permute.xlu0 %312 }
  0x92   : > { %v399_v27 = vpop.permute.xlu2 %398 }
  0x99   : > { %v265_v14 = vpop.permute.xlu1 %264  ;;  %v315_v15 = vpop.permute.xlu0 %314 }
  0x9a   : > { %v267_v16 = vsel %vm266_vm3, %v263_v11, %v265_v14  ;;  %v317_v17 = vsel %vm316_vm4, %v313_v12, %v315_v15 }
  0x9b   : > { %v276_v18 = vand.u32 %v274_v3, %v267_v16  ;;  %v322_v19 = vand.u32 %v317_v17, %v274_v3 }
  0x9d   : > { %285 = vmatpush.bf16.msra.mxu0 %v276_v18  ;;  %331 = vmatpush.bf16.msra.mxu2 %v322_v19 }
  0xa0   : > { %579 = vmatmul.msk.bf16.vlgmr.msra.gmra.mxu2 %vm268_vm1, %v578_v20  ;;  %576 = vmatmul.msk.bf16.vlgmr.msra.gmra.mxu0 %vm268_vm1, %v575_v21 }
  0xa1   : > { %v427_v23 = vpop.permute.xlu1 %426  ;;  %v425_v24 = vpop.permute.xlu0 %424 }
  0xa2   : > { %v429_v25 = vsel %vm428_vm5, %v425_v24, %v427_v23  ;;  %v306_v37 = vpop.f32.mrf.mxu1 }
  0xa3   : > { %v434_v26 = vand.u32 %v429_v25, %v274_v3 }
  0xa5   : > { %443 = vmatpush.bf16.msrb.mxu2 %v434_v26 }
  0xa9   : > { %v371_v28 = vpop.permute.xlu0 %370  ;;  %v397_v29 = vpop.permute.xlu1 %396 }
  0xaa   : > { %v373_v30 = vsel %vm372_vm6, %v369_v22, %v371_v28  ;;  %v401_v31 = vsel %vm400_vm7, %v397_v29, %v399_v27  ;;  %v308_v38 = vpop.f32.mrf.mxu1 }
  0xab   : > { %v378_v32 = vand.u32 %v373_v30, %v274_v3  ;;  %v406_v33 = vand.u32 %v401_v31, %v274_v3 }
  0xad   : > { %387 = vmatpush.bf16.msrb.mxu0 %v378_v32  ;;  %415 = vmatpush.bf16.msrb.mxu1 %v406_v33 }
  0xb0   : > { %587 = vmatmul.msk.bf16.vlgmr.msrb.gmra.mxu2 %vm268_vm1, %v586_v34  ;;  %583 = vmatmul.msk.bf16.vlgmr.msrb.gmra.mxu0 %vm268_vm1, %v582_v35 }
  0xb1   : > { %585 = vmatmul.msk.bf16.vlgmr.msrb.gmra.mxu1 %vm268_vm1, %v584_v36  ;;  %v453_v53 = vpop.permute.xlu0 %452 }
 0x10c   : > { %v361_v39 = vpop.f32.mrf.mxu3 }
 0x114   : > { %v363_v40 = vpop.f32.mrf.mxu3 }
 0x11d   : > { %v287_v41 = vpop.f32.mrf.mxu0 }
 0x11e   : > { %v307_v44 = vadd.f32 %v306_v37, %v287_v41 }
 0x123   : > { %v333_v42 = vpop.f32.mrf.mxu2 }
 0x124   : > { %v337_v45 = vadd.f32 %v333_v42, %v307_v44 }
 0x125   : > { %v289_v43 = vpop.f32.mrf.mxu0 }
 0x126   : > { %v365_v47 = vadd.f32 %v361_v39, %v337_v45 }
 0x12b   : > { %v335_v46 = vpop.f32.mrf.mxu2 }
 0x12d   : > { %v389_v48 = vpop.f32.mrf.mxu0 }
 0x12e   : > { %v393_v49 = vadd.f32 %v389_v48, %v365_v47  ;;  %v417_v50 = vpop.f32.mrf.mxu1 }
 0x130   : > { %v421_v51 = vadd.f32 %v417_v50, %v393_v49 }
 0x133   : > { %v445_v52 = vpop.f32.mrf.mxu2 }
 0x134   : > { %v449_v54 = vadd.f32 %v445_v52, %v421_v51 }
 0x135   : > { %v391_v55 = vpop.f32.mrf.mxu0 }
 0x136   : > { %v455_v56 = vadd.f32 %v453_v53, %v449_v54  ;;  %v419_v57 = vpop.f32.mrf.mxu1 }
 0x138   : > { %vm456_vm8 = vcmp.ge.f32.partialorder %v455_v56, 0.0  ;;  %v457_v58 = vmul.f32 0.2, %v455_v56 }
 0x13a   : > { %v458_v59 = vsel %vm456_vm8, %v455_v56, %v457_v58 }
 0x13b   : > { %v459_v60 = vpack.c.bf16 %v458_v59, %v458_v59  ;;  %v447_v61 = vpop.f32.mrf.mxu2 }
 0x13d   : > { %460 = vst [vmem:[%s236_s19] sm:$0x3] %v459_v60 }
 0x13e   : > { %700 = shalt.err (!%p697_p9)
}
 0x13f   : > { %594 = dma.vmem_to_hbm [thread:$0]  (%p852_p3), %s477_s8, 32, %s479_s9, %s462_s18  }
 0x140 PF: > { %p600_p10 = scmp.ge.s32.totalorder %s767_s22, 2  ;;  %s490_s14 = sand.u32 1, %s739_s15  }
 0x141   : > { %s491_s27 = scalar_lea.sflag [#allocation3], %s490_s14 }
 0x142   : > { %p597_p11 = pnand %p600_p10, %p861_p8 }
 0x144   : > { %p598_p12 = pneg %p597_p11 }
 0x146   : > { %734 = dma.done.wait (%p598_p12), %s491_s27, 32  }
 0x147   : > { %736 = vsyncadd (%p598_p12), %s491_s27, 4294967264  ;;  %s17_s22 = sadd.s32 1, %s767_s22   ;;  %s967_s28 = sld [smem:[#allocation5_spill]] }
 0x148   : > { %p14_p13 = scmp.ge.s32.totalorder %s17_s22, 14   ;;  %s968_s15 = smov %s743_s16 }
 0x149   : > { %s969_s16 = smov %s747_s17  ;;  %s970_s17 = smov %s870_s7 }
 0x14a   : > { %s971_s18 = smov %s759_s20  ;;  %s972_s19 = smov %s763_s21 }
 0x14b   : > { %s973_s20 = smov %s976_s25  ;;  %16 = sbr.rel (!%p14_p13) target bundleno = 5 (0x5), region = 80 }
 0x14d   : > { %s974_s21 = smov %s967_s28 }
 0x150   :  { %497 = vsyncpa [#allocation3], 1 }
 0x151   :  { %499 = vsyncpa [#allocation3 + $0x1], 1 }

</bundles_post_ra>
